<compile_context>
chip_gen: v6e
topology: v6e:2x2x1
jax: 0.10.0
libtpu: 0.0.40
codegen_flags: <defaults>
</compile_context>

<pallas_src>
import functools

import jax
import jax.numpy as jnp
from jax.experimental import pallas as pl
from jax.experimental.pallas import tpu as pltpu

EPS = 1e-5  # nn.LayerNorm default eps


def _layernorm(v, gamma, beta):
    mean = jnp.mean(v, axis=-1, keepdims=True)
    cent = v - mean
    var = jnp.mean(cent * cent, axis=-1, keepdims=True)
    return cent * jax.lax.rsqrt(var + EPS) * gamma + beta


def shap_attention_kernel(
    x_ref, shap_ref,       # (block_b, D_in), (block_b, D_shap)   stream dtype (bf16/f32)
    fp_w_ref,              # (D_in, H)   feature_proj weight (input_norm affine folded in)
    sp_w_ref,              # (D_shap, H) shap_proj weight
    wa_ref,                # (H, H)      fused attention weight  (wv @ wo)
    rows_ref,              # (9, H) f32: fp_b, fp_g, fp_bt, sp_b, sp_g, sp_bt, b_attn, out_g, out_b
    scale_ref,             # SMEM (1,) f32: shap_scale
    out_ref,               # (block_b, H)
    *,
    precision=None,        # optional lax.Precision for the three dots
):
    rows = rows_ref[...]
    fp_b, fp_g, fp_bt = rows[0:1], rows[1:2], rows[2:3]
    sp_b, sp_g, sp_bt = rows[3:4], rows[4:5], rows[5:6]
    b_attn, out_g, out_b = rows[6:7], rows[7:8], rows[8:9]

    dot_dtype = fp_w_ref.dtype  # bf16 by default (f32 if requested)

    # ---- input_norm (affine folded into fp_w / fp_b); stats in f32 ----
    x = x_ref[...].astype(jnp.float32)
    mean = jnp.mean(x, axis=-1, keepdims=True)
    cent = x - mean
    var = jnp.mean(cent * cent, axis=-1, keepdims=True)
    xn = cent * jax.lax.rsqrt(var + EPS)

    # ---- feature_proj: Linear -> GELU(exact, nn.GELU default) -> LayerNorm ----
    # (tanh-approx GELU would hit the otherwise-idle EUP slot; only worth it if a bundle
    #  dump ever shows VALU as the binding slot -- the kernel is HBM-bound as written.)
    h = jnp.dot(xn.astype(dot_dtype), fp_w_ref[...],
                preferred_element_type=jnp.float32, precision=precision) + fp_b
    h = 0.5 * h * (1.0 + jax.lax.erf(h * jnp.float32(0.7071067811865476)))
    x_proj = _layernorm(h, fp_g, fp_bt)

    # ---- shap_proj: Linear -> LayerNorm -> Dropout(eval: identity) ----
    sp = jnp.dot(shap_ref[...].astype(dot_dtype), sp_w_ref[...],
                 preferred_element_type=jnp.float32, precision=precision) + sp_b
    shap_p = _layernorm(sp, sp_g, sp_bt)

    # ---- SHAP gating ----
    scale = scale_ref[0]
    x_comb = x_proj * (1.0 + scale * jax.nn.sigmoid(shap_p))

    # ---- MultiheadAttention with L=S=1: softmax over one key == 1 (per head), so
    #      attn_out = out_proj(v_proj(x_comb)) = x_comb @ (wv @ wo) + (bv @ wo + bo)
    attn_out = jnp.dot(x_comb.astype(dot_dtype), wa_ref[...],
                       preferred_element_type=jnp.float32, precision=precision) + b_attn

    # ---- residual + final LayerNorm ----
    out = _layernorm(attn_out + x_proj, out_g, out_b)
    out_ref[...] = out.astype(out_ref.dtype)


def shap_attention(x, shap_weights, params, *, block_b=2048,
                   stream_dtype=jnp.bfloat16,
                   matmul_dtype=jnp.bfloat16,
                   out_dtype=None,
                   precision=None,
                   vmem_limit_bytes=48 * 1024 * 1024):
    """Fused eval-mode SHAPAttention forward.

    Returns (output (B, H) in `out_dtype`, attn_weights (B, 1, 1)).

    * stream_dtype: dtype the big activations (x, shap_weights) are streamed from HBM in
      (bf16 default: halves the dominant HBM traffic; the kernel is memory-bound).
    * matmul_dtype: dtype of weights / matmul operands (f32 MXU accumulation regardless).
    * out_dtype:    output dtype (defaults to stream_dtype -> bf16 output by default).
    * precision:    optional lax.Precision for the dots (e.g. HIGHEST with f32 operands).
    * block_b / vmem_limit_bytes: raise together on v6e/v7x (e.g. 4096 / 64 MiB) for the
      production 1024/1024/256 shapes; v7x has 64 MiB physical VMEM -- leave headroom.

    Assumes eval mode (all dropouts identity) and no attn_mask / key_padding_mask.
    `params` matrices are (in_features, out_features), i.e. PyTorch `.weight.T`.
    """
    B, D_in = x.shape
    _, D_shap = shap_weights.shape
    H = params["fp_w"].shape[1]
    if out_dtype is None:
        out_dtype = stream_dtype

    # --- stream the activations in a narrow dtype (cast fuses into the producer) ---
    if x.dtype != stream_dtype:
        x = x.astype(stream_dtype)
    if shap_weights.dtype != stream_dtype:
        shap_weights = shap_weights.astype(stream_dtype)

    # --- batch tiling: sublane-aligned tile, pad B instead of asserting divisibility ---
    bb = min(block_b, pl.cdiv(B, 8) * 8)
    if B > 8:
        # v7x megacore: keep >= 2 grid steps whenever the batch allows it so the
        # "parallel" axis can shard across both TensorCores.
        half = pl.cdiv(pl.cdiv(B, 2), 8) * 8
        bb = min(bb, half)
    bb = max(8, (bb // 8) * 8)
    pb = pl.cdiv(B, bb) * bb
    if pb != B:
        x = jnp.pad(x, ((0, pb - B), (0, 0)))
        shap_weights = jnp.pad(shap_weights, ((0, pb - B), (0, 0)))

    # --- trace-time parameter folding (exact in real arithmetic) ---
    f32 = jnp.float32
    in_g = params["in_g"].astype(f32)
    in_b = params["in_b"].astype(f32)
    fp_w0 = params["fp_w"].astype(f32)
    fp_w = in_g[:, None] * fp_w0                       # fold input_norm gamma into weight
    fp_b = params["fp_b"].astype(f32) + in_b @ fp_w0   # fold input_norm beta into bias
    sp_w = params["sp_w"].astype(f32)
    w_attn = params["wv"].astype(f32) @ params["wo"].astype(f32)
    b_attn = params["bv"].astype(f32) @ params["wo"].astype(f32) + params["bo"].astype(f32)

    rows = jnp.stack(
        [fp_b, params["fp_g"], params["fp_bt"],
         params["sp_b"], params["sp_g"], params["sp_bt"],
         b_attn, params["out_g"], params["out_b"]], axis=0).astype(f32)

    args = (
        x, shap_weights,
        fp_w.astype(matmul_dtype),
        sp_w.astype(matmul_dtype),
        w_attn.astype(matmul_dtype),
        rows,
        params["shap_scale"].reshape(1).astype(f32),
    )

    in_specs = [
        pl.BlockSpec((bb, D_in), lambda i: (i, 0)),
        pl.BlockSpec((bb, D_shap), lambda i: (i, 0)),
        # Constant block index (0,0): the Pallas pipeliner does not re-DMA these
        # weight slabs across grid steps.
        pl.BlockSpec((D_in, H), lambda i: (0, 0)),
        pl.BlockSpec((D_shap, H), lambda i: (0, 0)),
        pl.BlockSpec((H, H), lambda i: (0, 0)),
        pl.BlockSpec((9, H), lambda i: (0, 0)),
        pl.BlockSpec(memory_space=pltpu.MemorySpace.SMEM),
    ]
    # Lane-dense output: H is a multiple of 128 for the module defaults (256) and the demo
    # (128), so stores are unmasked `vst`.  If a deployment uses H < 128, prefer a
    # batch-on-lanes transposed layout ((H, bb) tiles) instead of this (bb, H) layout.
    out_specs = pl.BlockSpec((bb, H), lambda i: (i, 0))

    stream_sz = jnp.dtype(stream_dtype).itemsize
    out_sz = jnp.dtype(out_dtype).itemsize
    w_sz = jnp.dtype(matmul_dtype).itemsize
    cost = pl.CostEstimate(
        flops=int(2 * pb * H * (D_in + D_shap + H) + 12 * pb * H),
        transcendentals=int(2 * pb * H),
        bytes_accessed=int(pb * (D_in + D_shap) * stream_sz
                           + pb * H * out_sz
                           + (D_in + D_shap + H) * H * w_sz
                           + 9 * H * 4 + 4),
    )

    kernel = functools.partial(shap_attention_kernel, precision=precision)

    out = pl.pallas_call(
        kernel,
        out_shape=jax.ShapeDtypeStruct((pb, H), out_dtype),
        grid_spec=pltpu.PrefetchScalarGridSpec(
            num_scalar_prefetch=0,
            grid=(pb // bb,),
            in_specs=in_specs,
            out_specs=out_specs,
        ),
        compiler_params=pltpu.CompilerParams(
            dimension_semantics=("parallel",),
            vmem_limit_bytes=vmem_limit_bytes,
        ),
        cost_estimate=cost,
    )(*args)

    out = out[:B]
    # Averaged attention weights over a length-1 sequence are exactly 1:
    # shape (B, L, S) = (B, 1, 1).  Constant -> produced outside the kernel.
    attn_weights = jnp.ones((B, 1, 1), jnp.float32)
    return out, attn_weights


def init_params(key, input_dim, shap_dim, hidden_dim):
    """All matrices are (in_features, out_features) == PyTorch `.weight.T`."""
    ks = jax.random.split(key, 4)
    return {
        # input_norm
        "in_g": jnp.ones((input_dim,), jnp.float32),
        "in_b": jnp.zeros((input_dim,), jnp.float32),
        # feature_proj: Linear(input_dim, hidden) (xavier-ish) + LayerNorm
        "fp_w": jax.random.normal(ks[0], (input_dim, hidden_dim), jnp.float32)
                * (2.0 / (input_dim + hidden_dim)) ** 0.5,
        "fp_b": jnp.zeros((hidden_dim,), jnp.float32),
        "fp_g": jnp.ones((hidden_dim,), jnp.float32),
        "fp_bt": jnp.zeros((hidden_dim,), jnp.float32),
        # shap_proj: Linear(shap_dim, hidden) (kaiming-ish) + LayerNorm
        "sp_w": jax.random.normal(ks[1], (shap_dim, hidden_dim), jnp.float32)
                * (2.0 / shap_dim) ** 0.5,
        "sp_b": jnp.zeros((hidden_dim,), jnp.float32),
        "sp_g": jnp.ones((hidden_dim,), jnp.float32),
        "sp_bt": jnp.zeros((hidden_dim,), jnp.float32),
        # attention value / output projections (q/k do not affect output at L=S=1)
        "wv": jax.random.normal(ks[2], (hidden_dim, hidden_dim), jnp.float32)
              * (1.0 / hidden_dim) ** 0.5,
        "bv": jnp.zeros((hidden_dim,), jnp.float32),
        "wo": jax.random.normal(ks[3], (hidden_dim, hidden_dim), jnp.float32)
              * (1.0 / hidden_dim) ** 0.5,
        "bo": jnp.zeros((hidden_dim,), jnp.float32),
        # final layer_norm
        "out_g": jnp.ones((hidden_dim,), jnp.float32),
        "out_b": jnp.zeros((hidden_dim,), jnp.float32),
        # shap_scale
        "shap_scale": jnp.ones((1,), jnp.float32),
    }


def reference(x, shap_weights, p):
    """Plain-JAX fp32 reference of the eval-mode forward pass (unfused params)."""
    def ln(v, g, b):
        m = v.mean(-1, keepdims=True)
        c = v - m
        var = (c * c).mean(-1, keepdims=True)
        return c / jnp.sqrt(var + EPS) * g + b

    xn = ln(x, p["in_g"], p["in_b"])
    h = xn @ p["fp_w"] + p["fp_b"]
    h = jax.nn.gelu(h, approximate=False)
    x_proj = ln(h, p["fp_g"], p["fp_bt"])

    sp = shap_weights @ p["sp_w"] + p["sp_b"]
    shap_p = ln(sp, p["sp_g"], p["sp_bt"])

    x_comb = x_proj * (1.0 + p["shap_scale"][0] * jax.nn.sigmoid(shap_p))
    v = x_comb @ p["wv"] + p["bv"]
    attn_out = v @ p["wo"] + p["bo"]
    out = ln(attn_out + x_proj, p["out_g"], p["out_b"])
    attnw = jnp.ones((x.shape[0], 1, 1), jnp.float32)
    return out, attnw


if __name__ == "__main__":
    # Small, lane-dense shapes (module defaults are 1024/1024/256; 128s keep the demo
    # small while avoiding masked stores).  B=24 is a non-multiple of the 16-row tile,
    # exercising padding, and yields a 2-step grid (exercises the "parallel" batch axis).
    B, INPUT_DIM, SHAP_DIM, HIDDEN = 24, 128, 128, 128

    key = jax.random.PRNGKey(0)
    kx, ks, kp = jax.random.split(key, 3)
    x = jax.random.normal(kx, (B, INPUT_DIM), jnp.float32)
    shap_w = jax.random.normal(ks, (B, SHAP_DIM), jnp.float32)
    params = init_params(kp, INPUT_DIM, SHAP_DIM, HIDDEN)

    ref_out, ref_attn = reference(x, shap_w, params)

    # High-precision path (f32 streams / f32 matmul operands / f32 output) -- tight check.
    out32, attn32 = shap_attention(x, shap_w, params,
                                   stream_dtype=jnp.float32,
                                   matmul_dtype=jnp.float32,
                                   out_dtype=jnp.float32)
    out32 = jax.block_until_ready(out32)
    assert out32.shape == (B, HIDDEN) and attn32.shape == (B, 1, 1)
    assert jnp.allclose(out32, ref_out, atol=5e-4, rtol=5e-4)
    assert jnp.allclose(attn32, ref_attn)

    # Default perf path (bf16 streams, bf16 matmul operands w/ f32 MXU accumulation,
    # bf16 output) -- loose check.
    out_bf, attn_bf = shap_attention(x, shap_w, params)
    out_bf = jax.block_until_ready(out_bf)
    attn_bf = jax.block_until_ready(attn_bf)
    assert out_bf.shape == (B, HIDDEN) and attn_bf.shape == (B, 1, 1)
    assert out_bf.dtype == jnp.bfloat16
    assert jnp.allclose(out_bf.astype(jnp.float32), ref_out, atol=1e-1, rtol=1e-1)
    assert jnp.allclose(attn_bf, ref_attn)

    print("KERNEL_OK")
</pallas_src>

<mosaic_0001>
module attributes {stable_mosaic.version = 11 : i64} {
  func.func @shap_attention_kernel(%arg0: i32, %arg1: memref<16x128xf32, #tpu.memory_space<vmem>>, %arg2: memref<16x128xf32, #tpu.memory_space<vmem>>, %arg3: memref<128x128xf32, #tpu.memory_space<vmem>>, %arg4: memref<128x128xf32, #tpu.memory_space<vmem>>, %arg5: memref<128x128xf32, #tpu.memory_space<vmem>>, %arg6: memref<9x128xf32, #tpu.memory_space<vmem>>, %arg7: memref<1xf32, #tpu.memory_space<smem>>, %arg8: memref<16x128xf32, #tpu.memory_space<vmem>>) attributes {dimension_semantics = [#tpu.dimension_semantics<parallel>], iteration_bounds = array<i64: 2>, scalar_prefetch = 0 : i64, scratch_operands = 0 : i64, tpu.core_type = #tpu.core_type<tc>, window_params = [{transform_indices = @transform_0, window_bounds = array<i64: 16, 128>}, {transform_indices = @transform_1, window_bounds = array<i64: 16, 128>}, {pipeline_mode = #tpu.pipeline_mode<synchronous>, transform_indices = @transform_2, window_bounds = array<i64: 128, 128>}, {pipeline_mode = #tpu.pipeline_mode<synchronous>, transform_indices = @transform_3, window_bounds = array<i64: 128, 128>}, {pipeline_mode = #tpu.pipeline_mode<synchronous>, transform_indices = @transform_4, window_bounds = array<i64: 128, 128>}, {pipeline_mode = #tpu.pipeline_mode<synchronous>, transform_indices = @transform_5, window_bounds = array<i64: 9, 128>}, {transform_indices = @transform_6, window_bounds = array<i64: 1>}, {transform_indices = @transform_7, window_bounds = array<i64: 16, 128>}]} {
    %c0 = arith.constant 0 : index
    %c0_0 = arith.constant 0 : index
    %0 = vector.load %arg6[%c0, %c0_0] : memref<9x128xf32, #tpu.memory_space<vmem>>, vector<9x128xf32>
    %1 = vector.extract_strided_slice %0 {offsets = [0, 0], sizes = [1, 128], strides = [1, 1]} : vector<9x128xf32> to vector<1x128xf32>
    %2 = vector.extract_strided_slice %0 {offsets = [1, 0], sizes = [1, 128], strides = [1, 1]} : vector<9x128xf32> to vector<1x128xf32>
    %3 = vector.extract_strided_slice %0 {offsets = [2, 0], sizes = [1, 128], strides = [1, 1]} : vector<9x128xf32> to vector<1x128xf32>
    %4 = vector.extract_strided_slice %0 {offsets = [3, 0], sizes = [1, 128], strides = [1, 1]} : vector<9x128xf32> to vector<1x128xf32>
    %5 = vector.extract_strided_slice %0 {offsets = [4, 0], sizes = [1, 128], strides = [1, 1]} : vector<9x128xf32> to vector<1x128xf32>
    %6 = vector.extract_strided_slice %0 {offsets = [5, 0], sizes = [1, 128], strides = [1, 1]} : vector<9x128xf32> to vector<1x128xf32>
    %7 = vector.extract_strided_slice %0 {offsets = [6, 0], sizes = [1, 128], strides = [1, 1]} : vector<9x128xf32> to vector<1x128xf32>
    %8 = vector.extract_strided_slice %0 {offsets = [7, 0], sizes = [1, 128], strides = [1, 1]} : vector<9x128xf32> to vector<1x128xf32>
    %9 = vector.extract_strided_slice %0 {offsets = [8, 0], sizes = [1, 128], strides = [1, 1]} : vector<9x128xf32> to vector<1x128xf32>
    %c0_1 = arith.constant 0 : index
    %c0_2 = arith.constant 0 : index
    %10 = vector.load %arg1[%c0_1, %c0_2] : memref<16x128xf32, #tpu.memory_space<vmem>>, vector<16x128xf32>
    %cst = arith.constant dense<0.000000e+00> : vector<16xf32>
    %11 = vector.multi_reduction <add>, %10, %cst [1] : vector<16x128xf32> to vector<16xf32>
    %12 = vector.shape_cast %11 : vector<16xf32> to vector<16x1xf32>
    %cst_3 = arith.constant 1.280000e+02 : f32
    %13 = vector.broadcast %cst_3 : f32 to vector<16x1xf32>
    %14 = arith.divf %12, %13 : vector<16x1xf32>
    %15 = vector.broadcast %14 : vector<16x1xf32> to vector<16x128xf32>
    %16 = arith.subf %10, %15 : vector<16x128xf32>
    %17 = arith.mulf %16, %16 : vector<16x128xf32>
    %cst_4 = arith.constant dense<0.000000e+00> : vector<16xf32>
    %18 = vector.multi_reduction <add>, %17, %cst_4 [1] : vector<16x128xf32> to vector<16xf32>
    %19 = vector.shape_cast %18 : vector<16xf32> to vector<16x1xf32>
    %cst_5 = arith.constant 1.280000e+02 : f32
    %20 = vector.broadcast %cst_5 : f32 to vector<16x1xf32>
    %21 = arith.divf %19, %20 : vector<16x1xf32>
    %cst_6 = arith.constant 9.99999974E-6 : f32
    %22 = vector.broadcast %cst_6 : f32 to vector<16x1xf32>
    %23 = arith.addf %21, %22 : vector<16x1xf32>
    %24 = math.rsqrt %23 : vector<16x1xf32>
    %25 = vector.broadcast %24 : vector<16x1xf32> to vector<16x128xf32>
    %26 = arith.mulf %16, %25 : vector<16x128xf32>
    %c0_7 = arith.constant 0 : index
    %c0_8 = arith.constant 0 : index
    %27 = vector.load %arg3[%c0_7, %c0_8] : memref<128x128xf32, #tpu.memory_space<vmem>>, vector<128x128xf32>
    %cst_9 = arith.constant dense<0.000000e+00> : vector<16x128xf32>
    %28 = tpu.matmul %26, %27, %cst_9 {dimension_numbers = #tpu.dot_dimension_numbers<[1], [0], [0], [1], [0, 0, 1, 1], [], []>} : vector<16x128xf32>, vector<128x128xf32>, vector<16x128xf32> -> vector<16x128xf32>
    %29 = vector.broadcast %1 : vector<1x128xf32> to vector<16x128xf32>
    %30 = arith.addf %28, %29 : vector<16x128xf32>
    %cst_10 = arith.constant 5.000000e-01 : f32
    %31 = vector.broadcast %cst_10 : f32 to vector<16x128xf32>
    %32 = arith.mulf %31, %30 : vector<16x128xf32>
    %cst_11 = arith.constant 0.707106769 : f32
    %33 = vector.broadcast %cst_11 : f32 to vector<16x128xf32>
    %34 = arith.mulf %30, %33 : vector<16x128xf32>
    %35 = math.erf %34 : vector<16x128xf32>
    %cst_12 = arith.constant 1.000000e+00 : f32
    %36 = vector.broadcast %cst_12 : f32 to vector<16x128xf32>
    %37 = arith.addf %36, %35 : vector<16x128xf32>
    %38 = arith.mulf %32, %37 : vector<16x128xf32>
    %cst_13 = arith.constant dense<0.000000e+00> : vector<16xf32>
    %39 = vector.multi_reduction <add>, %38, %cst_13 [1] : vector<16x128xf32> to vector<16xf32>
    %40 = vector.shape_cast %39 : vector<16xf32> to vector<16x1xf32>
    %cst_14 = arith.constant 1.280000e+02 : f32
    %41 = vector.broadcast %cst_14 : f32 to vector<16x1xf32>
    %42 = arith.divf %40, %41 : vector<16x1xf32>
    %43 = vector.broadcast %42 : vector<16x1xf32> to vector<16x128xf32>
    %44 = arith.subf %38, %43 : vector<16x128xf32>
    %45 = arith.mulf %44, %44 : vector<16x128xf32>
    %cst_15 = arith.constant dense<0.000000e+00> : vector<16xf32>
    %46 = vector.multi_reduction <add>, %45, %cst_15 [1] : vector<16x128xf32> to vector<16xf32>
    %47 = vector.shape_cast %46 : vector<16xf32> to vector<16x1xf32>
    %cst_16 = arith.constant 1.280000e+02 : f32
    %48 = vector.broadcast %cst_16 : f32 to vector<16x1xf32>
    %49 = arith.divf %47, %48 : vector<16x1xf32>
    %cst_17 = arith.constant 9.99999974E-6 : f32
    %50 = vector.broadcast %cst_17 : f32 to vector<16x1xf32>
    %51 = arith.addf %49, %50 : vector<16x1xf32>
    %52 = math.rsqrt %51 : vector<16x1xf32>
    %53 = vector.broadcast %52 : vector<16x1xf32> to vector<16x128xf32>
    %54 = arith.mulf %44, %53 : vector<16x128xf32>
    %55 = vector.broadcast %2 : vector<1x128xf32> to vector<16x128xf32>
    %56 = arith.mulf %54, %55 : vector<16x128xf32>
    %57 = vector.broadcast %3 : vector<1x128xf32> to vector<16x128xf32>
    %58 = arith.addf %56, %57 : vector<16x128xf32>
    %c0_18 = arith.constant 0 : index
    %c0_19 = arith.constant 0 : index
    %59 = vector.load %arg2[%c0_18, %c0_19] : memref<16x128xf32, #tpu.memory_space<vmem>>, vector<16x128xf32>
    %c0_20 = arith.constant 0 : index
    %c0_21 = arith.constant 0 : index
    %60 = vector.load %arg4[%c0_20, %c0_21] : memref<128x128xf32, #tpu.memory_space<vmem>>, vector<128x128xf32>
    %cst_22 = arith.constant dense<0.000000e+00> : vector<16x128xf32>
    %61 = tpu.matmul %59, %60, %cst_22 {dimension_numbers = #tpu.dot_dimension_numbers<[1], [0], [0], [1], [0, 0, 1, 1], [], []>} : vector<16x128xf32>, vector<128x128xf32>, vector<16x128xf32> -> vector<16x128xf32>
    %62 = vector.broadcast %4 : vector<1x128xf32> to vector<16x128xf32>
    %63 = arith.addf %61, %62 : vector<16x128xf32>
    %cst_23 = arith.constant dense<0.000000e+00> : vector<16xf32>
    %64 = vector.multi_reduction <add>, %63, %cst_23 [1] : vector<16x128xf32> to vector<16xf32>
    %65 = vector.shape_cast %64 : vector<16xf32> to vector<16x1xf32>
    %cst_24 = arith.constant 1.280000e+02 : f32
    %66 = vector.broadcast %cst_24 : f32 to vector<16x1xf32>
    %67 = arith.divf %65, %66 : vector<16x1xf32>
    %68 = vector.broadcast %67 : vector<16x1xf32> to vector<16x128xf32>
    %69 = arith.subf %63, %68 : vector<16x128xf32>
    %70 = arith.mulf %69, %69 : vector<16x128xf32>
    %cst_25 = arith.constant dense<0.000000e+00> : vector<16xf32>
    %71 = vector.multi_reduction <add>, %70, %cst_25 [1] : vector<16x128xf32> to vector<16xf32>
    %72 = vector.shape_cast %71 : vector<16xf32> to vector<16x1xf32>
    %cst_26 = arith.constant 1.280000e+02 : f32
    %73 = vector.broadcast %cst_26 : f32 to vector<16x1xf32>
    %74 = arith.divf %72, %73 : vector<16x1xf32>
    %cst_27 = arith.constant 9.99999974E-6 : f32
    %75 = vector.broadcast %cst_27 : f32 to vector<16x1xf32>
    %76 = arith.addf %74, %75 : vector<16x1xf32>
    %77 = math.rsqrt %76 : vector<16x1xf32>
    %78 = vector.broadcast %77 : vector<16x1xf32> to vector<16x128xf32>
    %79 = arith.mulf %69, %78 : vector<16x128xf32>
    %80 = vector.broadcast %5 : vector<1x128xf32> to vector<16x128xf32>
    %81 = arith.mulf %79, %80 : vector<16x128xf32>
    %82 = vector.broadcast %6 : vector<1x128xf32> to vector<16x128xf32>
    %83 = arith.addf %81, %82 : vector<16x128xf32>
    %c0_28 = arith.constant 0 : index
    %84 = memref.load %arg7[%c0_28] : memref<1xf32, #tpu.memory_space<smem>>
    %85 = arith.negf %83 : vector<16x128xf32>
    %86 = math.exp %85 : vector<16x128xf32>
    %cst_29 = arith.constant 1.000000e+00 : f32
    %87 = vector.broadcast %cst_29 : f32 to vector<16x128xf32>
    %88 = arith.addf %87, %86 : vector<16x128xf32>
    %89 = arith.divf %87, %88 : vector<16x128xf32>
    %90 = vector.broadcast %84 : f32 to vector<16x128xf32>
    %91 = arith.mulf %90, %89 : vector<16x128xf32>
    %cst_30 = arith.constant 1.000000e+00 : f32
    %92 = vector.broadcast %cst_30 : f32 to vector<16x128xf32>
    %93 = arith.addf %92, %91 : vector<16x128xf32>
    %94 = arith.mulf %58, %93 : vector<16x128xf32>
    %c0_31 = arith.constant 0 : index
    %c0_32 = arith.constant 0 : index
    %95 = vector.load %arg5[%c0_31, %c0_32] : memref<128x128xf32, #tpu.memory_space<vmem>>, vector<128x128xf32>
    %cst_33 = arith.constant dense<0.000000e+00> : vector<16x128xf32>
    %96 = tpu.matmul %94, %95, %cst_33 {dimension_numbers = #tpu.dot_dimension_numbers<[1], [0], [0], [1], [0, 0, 1, 1], [], []>} : vector<16x128xf32>, vector<128x128xf32>, vector<16x128xf32> -> vector<16x128xf32>
    %97 = vector.broadcast %7 : vector<1x128xf32> to vector<16x128xf32>
    %98 = arith.addf %96, %97 : vector<16x128xf32>
    %99 = arith.addf %98, %58 : vector<16x128xf32>
    %cst_34 = arith.constant dense<0.000000e+00> : vector<16xf32>
    %100 = vector.multi_reduction <add>, %99, %cst_34 [1] : vector<16x128xf32> to vector<16xf32>
    %101 = vector.shape_cast %100 : vector<16xf32> to vector<16x1xf32>
    %cst_35 = arith.constant 1.280000e+02 : f32
    %102 = vector.broadcast %cst_35 : f32 to vector<16x1xf32>
    %103 = arith.divf %101, %102 : vector<16x1xf32>
    %104 = vector.broadcast %103 : vector<16x1xf32> to vector<16x128xf32>
    %105 = arith.subf %99, %104 : vector<16x128xf32>
    %106 = arith.mulf %105, %105 : vector<16x128xf32>
    %cst_36 = arith.constant dense<0.000000e+00> : vector<16xf32>
    %107 = vector.multi_reduction <add>, %106, %cst_36 [1] : vector<16x128xf32> to vector<16xf32>
    %108 = vector.shape_cast %107 : vector<16xf32> to vector<16x1xf32>
    %cst_37 = arith.constant 1.280000e+02 : f32
    %109 = vector.broadcast %cst_37 : f32 to vector<16x1xf32>
    %110 = arith.divf %108, %109 : vector<16x1xf32>
    %cst_38 = arith.constant 9.99999974E-6 : f32
    %111 = vector.broadcast %cst_38 : f32 to vector<16x1xf32>
    %112 = arith.addf %110, %111 : vector<16x1xf32>
    %113 = math.rsqrt %112 : vector<16x1xf32>
    %114 = vector.broadcast %113 : vector<16x1xf32> to vector<16x128xf32>
    %115 = arith.mulf %105, %114 : vector<16x128xf32>
    %116 = vector.broadcast %8 : vector<1x128xf32> to vector<16x128xf32>
    %117 = arith.mulf %115, %116 : vector<16x128xf32>
    %118 = vector.broadcast %9 : vector<1x128xf32> to vector<16x128xf32>
    %119 = arith.addf %117, %118 : vector<16x128xf32>
    %c0_39 = arith.constant 0 : index
    %c0_40 = arith.constant 0 : index
    %120 = vector.load %arg8[%c0_39, %c0_40] : memref<16x128xf32, #tpu.memory_space<vmem>>, vector<16x128xf32>
    tpu.vector_store %arg8[%c0_39, %c0_40], %119 {strides = array<i32>} : memref<16x128xf32, #tpu.memory_space<vmem>>, vector<16x128xf32>,
    return
  }
  func.func @transform_0(%arg0: i32) -> (i32, i32) {
    %c0_i32 = arith.constant 0 : i32
    %c0_i32_0 = arith.constant 0 : i32
    return %arg0, %c0_i32 : i32, i32
  }
  func.func @transform_1(%arg0: i32) -> (i32, i32) {
    %c0_i32 = arith.constant 0 : i32
    %c0_i32_0 = arith.constant 0 : i32
    return %arg0, %c0_i32 : i32, i32
  }
  func.func @transform_2(%arg0: i32) -> (i32, i32) {
    %c0_i32 = arith.constant 0 : i32
    %c0_i32_0 = arith.constant 0 : i32
    %c0_i32_1 = arith.constant 0 : i32
    return %c0_i32, %c0_i32_0 : i32, i32
  }
  func.func @transform_3(%arg0: i32) -> (i32, i32) {
    %c0_i32 = arith.constant 0 : i32
    %c0_i32_0 = arith.constant 0 : i32
    %c0_i32_1 = arith.constant 0 : i32
    return %c0_i32, %c0_i32_0 : i32, i32
  }
  func.func @transform_4(%arg0: i32) -> (i32, i32) {
    %c0_i32 = arith.constant 0 : i32
    %c0_i32_0 = arith.constant 0 : i32
    %c0_i32_1 = arith.constant 0 : i32
    return %c0_i32, %c0_i32_0 : i32, i32
  }
  func.func @transform_5(%arg0: i32) -> (i32, i32) {
    %c0_i32 = arith.constant 0 : i32
    %c0_i32_0 = arith.constant 0 : i32
    %c0_i32_1 = arith.constant 0 : i32
    return %c0_i32, %c0_i32_0 : i32, i32
  }
  func.func @transform_6(%arg0: i32) -> i32 {
    %c0_i32 = arith.constant 0 : i32
    %c0_i32_0 = arith.constant 0 : i32
    return %c0_i32 : i32
  }
  func.func @transform_7(%arg0: i32) -> (i32, i32) {
    %c0_i32 = arith.constant 0 : i32
    %c0_i32_0 = arith.constant 0 : i32
    return %arg0, %c0_i32 : i32, i32
  }
}

</mosaic_0001>

<bundles_post_ra>
// kernel: tpu_custom_call.1
= control target key start
LH: loop header
LB: loop body
LE: loop exit
PB: predicated region body
PF: predicated region fallthrough
CT: control target
= control target key end

     0   :  { %s1949_s0 = inlined_call_operand.hbm [shape: f32[32,128], index: 0, kind: input, shape index: {}]   ;;  %s1950_s1 = inlined_call_operand.hbm [shape: f32[32,128], index: 1, kind: input, shape index: {}]   ;;  %s1951_s2 = inlined_call_operand.hbm [shape: f32[128,128], index: 2, kind: input, shape index: {}]   ;;  %s1952_s3 = inlined_call_operand.hbm [shape: f32[128,128], index: 3, kind: input, shape index: {}]   ;;  %s1953_s4 = inlined_call_operand.hbm [shape: f32[128,128], index: 4, kind: input, shape index: {}]   ;;  %s1954_s5 = inlined_call_operand.hbm [shape: f32[9,128], index: 5, kind: input, shape index: {}]   ;;  %s1955_s6 = inlined_call_operand.<no memory space> [shape: f32[1], index: 6, kind: input, shape index: {}]   ;;  %s1956_s7 = inlined_call_operand.hbm [shape: f32[32,128], index: 7, kind: output, shape index: {}]  }
   0x1   :  { %1964 = sst [smem:[#allocation21_spill]] %s1949_s0 }
   0x2   :  { %1965 = sst [smem:[#allocation22_spill]] %s1951_s2 }
   0x3   :  { %1966 = sst [smem:[#allocation23_spill]] %s1952_s3 }
   0x4   :  { %12 = sst [smem:[#allocation2]] %s1955_s6 }
   0x5   :  { %13 = vsyncpa [#allocation4], 0 }
   0x6   :  { %15 = vsyncpa [#allocation4 + $0x1], 0 }
   0x7   :  { %16 = vsyncpa [#allocation7], 0 }
   0x8   :  { %18 = vsyncpa [#allocation7 + $0x1], 0 }
   0x9   :  { %19 = vsyncpa [#allocation10], 0 }
   0xa   :  { %20 = vsyncpa [#allocation13], 0 }
   0xb   :  { %21 = vsyncpa [#allocation5], 0 }
   0xc   :  { %23 = vsyncpa [#allocation5 + $0x1], 0  ;;  %s1608_s26 = smov 0   ;;  %s1610_s27 = smov 0  }
   0xd   :  { %s1612_s28 = smov 0   ;;  %s1614_s29 = smov 0  }
   0xe LB: > { %s1629_s6 = sadd.s32 4294967295, %s1552_s29   ;;  %s997_s30 = sadd.s32 4294967294, %s1552_s29   ;;  %s1552_s29 = sphi %s1614_s29, %s1991_s29   ;;  %s1548_s28 = sphi %s1612_s28, %s1990_s28   ;;  %s1544_s27 = sphi %s1610_s27, %s1989_s27   ;;  %s1540_s26 = sphi %s1608_s26, %s1988_s26  }
   0xf   : > { %p49_p0 = scmp.ne.s32.totalorder %s1544_s27, %s1540_s26  ;;  %p1957_p1 = scmp.eq.s32.totalorder %s1629_s6, 0 }
  0x10   : > { %p204_p2 = scmp.eq.s32.totalorder %s1629_s6, 1  ;;  %p210_p3 = scmp.eq.s32.totalorder %s997_s30, 1 }
  0x11   : > { %p1638_p4 = por %p1957_p1, %p49_p0  ;;  %p998_p5 = scmp.ge.s32.totalorder %s1552_s29, 1 }
  0x12   : > { %p1643_p6 = por %p210_p3, %p49_p0  ;;  %p217_p7 = scmp.lt.s32.totalorder %s1552_s29, 3 }
  0x13   : > { %s1967_s8 = scalar_select %p1638_p4, 1, 0 }
  0x14   : > { %s1968_s9 = scalar_select %p1643_p6, 1, 0 }
  0x15   : > { %p1648_p8 = pnand %p998_p5, %p217_p7  ;;  %s1554_s11 = smov [#allocation8]  }
  0x16   : > { %s229_s12 = sshll.u32 %s1554_s11, 4  ;;  %s1555_s14 = smov [#allocation9]   ;;  %s230_s12 = int_to_ptr.vmem [resolvable:$true] %s229_s12 }
  0x17   : > { %p1210_p9 = pneg %p1648_p8  ;;  %s242_s15 = sshll.u32 %s1555_s14, 4  ;;  %s243_s15 = int_to_ptr.vmem [resolvable:$true] %s242_s15 }
  0x18   : > { %s1556_s16 = smov [#allocation11]   ;;  %s1323_s18 = scalar_lea.vmem %s230_s12, 2048 }
  0x19   : > { %p1657_p11 = pnand %p1210_p9, %p1957_p1  ;;  %s255_s17 = sshll.u32 %s1556_s16, 4  ;;  %s256_s17 = int_to_ptr.vmem [resolvable:$true] %s255_s17 }
  0x1a   : > { %p1324_p13 = scmp.ne.s32.totalorder %s230_s12, %s1323_s18  ;;  %p1331_p5 = scmp.lt.s32.totalorder %s230_s12, %s230_s12 }
  0x1b   : > { %p1314_p12 = pneg %p1657_p11  ;;  %p1332_p7 = scmp.lt.s32.totalorder %s1323_s18, %s1323_s18 }
  0x1d   : > { %p1326_p0 = pnand %p1324_p13, %p1314_p12  ;;  %p1333_p9 = por %p1332_p7, %p1331_p5 }
  0x1f   : > { %p1327_p3 = pneg %p1326_p0 }
  0x21   : > { %p1334_p10 = pnand %p1333_p9, %p1327_p3 }
  0x23   : > { %1337 = shalt.err (!%p1334_p10)
}
  0x24   : > { %s1958_s19 = smov 128   ;;  %s1960_s20 = smov 8  }
  0x25   : > { %s1971_s2 = sld [smem:[#allocation22_spill]]  ;;  %s1349_s23 = scalar_lea.vmem %s243_s15, 2048 }
  0x26   : > { %p1350_p13 = scmp.ne.s32.totalorder %s243_s15, %s1349_s23  ;;  %p1357_p3 = scmp.lt.s32.totalorder %s243_s15, %s243_s15 }
  0x27   : > { %p1358_p10 = scmp.lt.s32.totalorder %s1349_s23, %s1349_s23 }
  0x28   : > { %p1352_p0 = pnand %p1350_p13, %p1314_p12 }
  0x29   : > { %p1359_p7 = por %p1358_p10, %p1357_p3 }
  0x2a   : > { %p1353_p5 = pneg %p1352_p0 }
  0x2b   : > { %1213 = dma.hbm_to_vmem [thread:$0]  (!%p1657_p11), %s1971_s2, 2048, %s230_s12, [#allocation7], %s1958_s19, %s1958_s19, %s1960_s20  }
  0x2c   : > { %p1360_p9 = pnand %p1359_p7, %p1353_p5 }
  0x2e   : > { %1363 = shalt.err (!%p1360_p9)
}
  0x2f   : > { %s1972_s3 = sld [smem:[#allocation23_spill]]  ;;  %s1375_s30 = scalar_lea.vmem %s256_s17, 2048 }
  0x30   : > { %p1376_p1 = scmp.ne.s32.totalorder %s256_s17, %s1375_s30  ;;  %p1383_p3 = scmp.lt.s32.totalorder %s256_s17, %s256_s17 }
  0x31   : > { %p1384_p5 = scmp.lt.s32.totalorder %s1375_s30, %s1375_s30 }
  0x32   : > { %p1378_p13 = pnand %p1376_p1, %p1314_p12 }
  0x33   : > { %p1385_p10 = por %p1384_p5, %p1383_p3 }
  0x34   : > { %p1379_p0 = pneg %p1378_p13 }
  0x35   : > { %1216 = dma.hbm_to_vmem [thread:$0]  (!%p1657_p11), %s1972_s3, 2048, %s243_s15, [#allocation10], %s1958_s19, %s1958_s19, %s1960_s20  }
  0x36   : > { %p1386_p7 = pnand %p1385_p10, %p1379_p0 }
  0x38   : > { %1389 = shalt.err (!%p1386_p7)
}
  0x39   : > { %1219 = dma.hbm_to_vmem [thread:$0]  (!%p1657_p11), %s1953_s4, 2048, %s256_s17, [#allocation10], %s1958_s19, %s1958_s19, %s1960_s20  }
  0x3a   : > { %s1559_s14 = smov [#allocation12]  }
  0x3b   : > { %s268_s15 = sshll.u32 %s1559_s14, 4  ;;  %s269_s15 = int_to_ptr.vmem [resolvable:$true] %s268_s15 }
  0x3c   : > { %s1401_s16 = scalar_lea.vmem %s269_s15, 256  ;;  %p1409_p0 = scmp.lt.s32.totalorder %s269_s15, %s269_s15 }
  0x3d   : > { %p1402_p1 = scmp.ne.s32.totalorder %s269_s15, %s1401_s16  ;;  %p1410_p3 = scmp.lt.s32.totalorder %s1401_s16, %s1401_s16 }
  0x3f   : > { %p1404_p9 = pnand %p1402_p1, %p1314_p12  ;;  %p1411_p5 = por %p1410_p3, %p1409_p0 }
  0x41   : > { %p1405_p13 = pneg %p1404_p9 }
  0x43   : > { %p1412_p10 = pnand %p1411_p5, %p1405_p13 }
  0x45   : > { %1415 = shalt.err (!%p1412_p10)
}
  0x46   : > { %1222 = dma.hbm_to_vmem [thread:$0]  (!%p1657_p11), %s1954_s5, 256, %s269_s15, [#allocation13], %s1958_s19, %s1958_s19, %s1960_s20  }
  0x47   : > { %s1708_s21 = sadd.s32 1, %s1552_s29   ;;  %s36_s13 = sadd.s32 1, %s1548_s28 }
  0x48   : > { %s33_s22 = ssub.s32 %s1552_s29, %s1708_s21  ;;  %p43_p12 = scmp.ne.s32.totalorder %s1548_s28, %s1544_s27 }
  0x49   : > { %p34_p7 = scmp.eq.s32.totalorder %s33_s22, 0  ;;  %p44_p1 = scmp.eq.s32.totalorder %s1552_s29, 0 }
  0x4a   : > { %p1718_p9 = por %p204_p2, %p43_p12  ;;  %p1238_p13 = scmp.lt.s32.totalorder %s1552_s29, 2 }
  0x4b   : > { %s1724_s24 = scalar_select %p34_p7, %s1548_s28, %s36_s13  }
  0x4c   : > { %s1973_s23 = scalar_select %p1718_p9, 1, 0 }
  0x4d   : > { %p45_p0 = por %p44_p1, %p43_p12  ;;  %s285_s25 = sand.u32 1, %s1548_s28  }
  0x4e   : > { %s1004_s30 = sshll.u32 %s285_s25, 4  ;;  %s1026_s11 = sshll.u32 %s1552_s29, 8 }
  0x4f   : > { %s1974_s0 = sld [smem:[#allocation21_spill]]  ;;  %s289_s16 = scalar_lea.vmem [#allocation3], %s1004_s30 }
  0x50   : > { %s296_s17 = sshll.u32 %s289_s16, 4  ;;  %p1735_p2 = pnand %p1238_p13, %p45_p0  ;;  %s1733_s17 = int_to_ptr.vmem [resolvable:$true] %s296_s17 }
  0x51   : > { %s1742_s19 = scalar_lea.hbm %s1950_s1, %s1026_s11  ;;  %s310_s12 = scalar_lea.vmem [#allocation6], %s1004_s30 }
  0x52   : > { %s1744_s14 = sshll.u32 %s310_s12, 4  ;;  %s1746_s20 = scalar_lea.sflag [#allocation4], %s285_s25  ;;  %s1777_s14 = int_to_ptr.vmem [resolvable:$true] %s1744_s14 }
  0x53   : > { %p1418_p3 = pneg %p1735_p2 }
  0x55   : > { %s1731_s15 = scalar_lea.hbm %s1974_s0, %s1026_s11  ;;  %s1421_s13 = scalar_lea.hbm %s1974_s0, 512 }
  0x56   : > { %s1416_s2 = scalar_lea.hbm %s1731_s15, 256  ;;  %p1422_p12 = scmp.lt.s32.totalorder %s1731_s15, %s1974_s0 }
  0x57   : > { %p1417_p11 = scmp.ne.s32.totalorder %s1731_s15, %s1416_s2  ;;  %p1423_p7 = scmp.lt.s32.totalorder %s1421_s13, %s1416_s2 }
  0x59   : > { %p1419_p5 = pnand %p1418_p3, %p1417_p11  ;;  %p1424_p1 = por %p1423_p7, %p1422_p12 }
  0x5b   : > { %p1420_p10 = pneg %p1419_p5 }
  0x5d   : > { %p1425_p13 = pnand %p1424_p1, %p1420_p10 }
  0x5f   : > { %1428 = shalt.err (!%p1425_p13)
}
  0x60   : > { %s1429_s25 = scalar_lea.vmem %s1733_s17, 256  ;;  %s1560_s3 = smov [#allocation3]  }
  0x61   : > { %p1430_p0 = scmp.ne.s32.totalorder %s1733_s17, %s1429_s25  ;;  %s1434_s30 = sshll.u32 %s1560_s3, 4  ;;  %s1435_s30 = int_to_ptr.vmem [resolvable:$false] %s1434_s30 }
  0x62   : > { %s1436_s12 = scalar_lea.vmem %s1435_s30, 512  ;;  %p1437_p6 = scmp.lt.s32.totalorder %s1733_s17, %s1435_s30 }
  0x63   : > { %p1432_p11 = pnand %p1430_p0, %p1418_p3  ;;  %p1438_p9 = scmp.lt.s32.totalorder %s1436_s12, %s1429_s25 }
  0x65   : > { %p1433_p5 = pneg %p1432_p11  ;;  %p1439_p4 = por %p1438_p9, %p1437_p6 }
  0x67   : > { %p1440_p12 = pnand %p1439_p4, %p1433_p5 }
  0x69   : > { %1443 = shalt.err (!%p1440_p12)
}
  0x6a   : > { %s1976_s2 = smov 8   ;;  %s1977_s16 = smov 128  }
  0x6b   : > { %1226 = dma.hbm_to_vmem [thread:$0]  (!%p1735_p2), %s1731_s15, 256, %s1733_s17, %s1746_s20, %s1977_s16, %s1977_s16, %s1976_s2  }
  0x6c   : > { %s306_s13 = sand.u32 1, %s1552_s29   ;;  %s1444_s11 = scalar_lea.hbm %s1742_s19, 256 }
  0x6d   : > { %s307_s22 = scalar_lea.sflag [#allocation7], %s306_s13  ;;  %p1445_p4 = scmp.ne.s32.totalorder %s1742_s19, %s1444_s11 }
  0x6e   : > { %s1449_s30 = scalar_lea.hbm %s1950_s1, 512  ;;  %p1450_p10 = scmp.lt.s32.totalorder %s1742_s19, %s1950_s1 }
  0x6f   : > { %p1447_p6 = pnand %p1445_p4, %p1418_p3  ;;  %p1451_p7 = scmp.lt.s32.totalorder %s1449_s30, %s1444_s11 }
  0x71   : > { %p1448_p9 = pneg %p1447_p6  ;;  %p1452_p1 = por %p1451_p7, %p1450_p10 }
  0x73   : > { %p1453_p13 = pnand %p1452_p1, %p1448_p9 }
  0x75   : > { %1456 = shalt.err (!%p1453_p13)
}
  0x76   : > { %s1457_s20 = scalar_lea.vmem %s1777_s14, 256  ;;  %s1561_s15 = smov [#allocation6]  }
  0x77   : > { %p1458_p0 = scmp.ne.s32.totalorder %s1777_s14, %s1457_s20  ;;  %s1462_s17 = sshll.u32 %s1561_s15, 4  ;;  %s1463_s17 = int_to_ptr.vmem [resolvable:$false] %s1462_s17 }
  0x78   : > { %s1464_s13 = scalar_lea.vmem %s1463_s17, 512  ;;  %p1465_p12 = scmp.lt.s32.totalorder %s1777_s14, %s1463_s17 }
  0x79   : > { %p1460_p11 = pnand %p1458_p0, %p1418_p3  ;;  %p1466_p4 = scmp.lt.s32.totalorder %s1464_s13, %s1457_s20 }
  0x7b   : > { %p1461_p5 = pneg %p1460_p11  ;;  %p1467_p6 = por %p1466_p4, %p1465_p12 }
  0x7d   : > { %p1468_p10 = pnand %p1467_p6, %p1461_p5 }
  0x7f   : > { %1471 = shalt.err (!%p1468_p10)
}
  0x80   : > { %1229 = dma.hbm_to_vmem [thread:$0]  (!%p1735_p2), %s1742_s19, 256, %s1777_s14, %s307_s22, %s1977_s16, %s1977_s16, %s1976_s2  }
  0x81   : > { %329 = sbr.rel (%p1648_p8) target bundleno = 1500 (0x5dc), region = 48  ;;  %s1808_s0 = sand.u32 (!%p1648_p8), 1, %s1544_s27  }
  0x82   : > { %s1811_s11 = sshll.u32 (!%p1648_p8), %s1808_s0, 4  ;;  %s332_s25 = scalar_lea.sflag (!%p1648_p8), [#allocation4], %s1808_s0 }
  0x83   : > { %s335_s18 = scalar_lea.vmem (!%p1648_p8), [#allocation3], %s1811_s11  ;;  %p1978_p3 = scmp.ne.s32.totalorder (!%p1648_p8), %s1967_s8, 0 }
  0x86   : > { %1515 = dma.done.wait (%p1978_p3), %s332_s25, 256  }
  0x87   : > { %1517 = vsyncadd (%p1978_p3), %s332_s25, 4294967040  ;;  %s340_s10 = sand.u32 1, %s1629_s6   ;;  %s344_s14 = scalar_lea.vmem [#allocation6], %s1811_s11 }
  0x88   : > { %s341_s19 = scalar_lea.sflag [#allocation7], %s340_s10 }
  0x89   : > { %1519 = dma.done.wait (%p1978_p3), %s341_s19, 256  }
  0x8a   : > { %1521 = vsyncadd (%p1978_p3), %s341_s19, 4294967040  ;;  %p1979_p8 = scmp.eq.s32.totalorder %s1629_s6, 0 }
  0x8c   : > { %1523 = dma.done.wait (%p1979_p8), [#allocation7], 2048   ;;  %p1980_p2 = pmov %p1979_p8 }
  0x8e   : > { %1525 = vsyncadd (%p1980_p2), [#allocation7], 4294965248  ;;  %p1981_p9 = pmov %p1980_p2 }
  0x8f   : > { %p1982_p7 = pmov %p1980_p2 }
  0x90   : > { %1527 = dma.done.wait (%p1981_p9), [#allocation10], 4096  }
  0x91   : > { %1529 = vsyncadd (%p1982_p7), [#allocation10], 4294963200  ;;  %p1983_p1 = pmov %p1980_p2 }
  0x93   : > { %1531 = dma.done.wait (%p1983_p1), [#allocation13], 256   ;;  %p1984_p13 = pmov %p1983_p1 }
  0x94   : > { %v1837_v0 = vld [vmem:[%s335_s18] sm:$0xff]  ;;  %v582_v1 = vld [vmem:[#allocation9 + $0x78] sm:$0xff]  ;;  %v580_v4 = vld [vmem:[#allocation9 + $0x68] sm:$0xff]  ;;  %v442_v44 = vlaneseq  ;;  %s696_s8 = sld [smem:[#allocation2]]  ;;  %s1028_s2 = sshll.u32 %s1629_s6, 8 }
  0x95   : > { %1533 = vsyncadd (%p1984_p13), [#allocation13], 4294967040  ;;  %403 = vadd.xlane.f32.xlu0 %v1837_v0  ;;  %1118 = vmatprep.subr.mxu1 %v582_v1  ;;  %v581_v2 = vld [vmem:[#allocation9 + $0x70] sm:$0xff]  ;;  %v1840_v3 = vld [vmem:[%s335_s18 + $0x8] sm:$0xff]  ;;  %s395_s16 = scalar_lea.vmem [#allocation14], %s1811_s11  ;;  %s1904_s12 = scalar_lea.hbm %s1956_s7, %s1028_s2 }
  0x96   : > { %1119 = vmatpush3.msra.mxu1 %v582_v1  ;;  %v579_v5 = vld [vmem:[#allocation9 + $0x60] sm:$0xff]  ;;  %v578_v6 = vld [vmem:[#allocation9 + $0x58] sm:$0xff]  ;;  %v577_v7 = vld [vmem:[#allocation9 + $0x50] sm:$0xff]  ;;  %v1857_v45 = vshrl.u32 %v442_v44, 7  ;;  %s863_s22 = sshll.u32 %s395_s16, 4  ;;  %s850_s20 = scalar_lea.sflag [#allocation5], %s1808_s0  ;;  %s1906_s22 = int_to_ptr.vmem [resolvable:$true] %s863_s22 }
  0x97   : > { %1120 = vmatprep.subr.mxu1 %v581_v2  ;;  %v576_v8 = vld [vmem:[#allocation9 + $0x48] sm:$0xff]  ;;  %v575_v9 = vld [vmem:[#allocation9 + $0x40] sm:$0xff]  ;;  %v574_v10 = vld [vmem:[#allocation9 + $0x38] sm:$0xff]  ;;  %s1472_s15 = scalar_lea.vmem %s1906_s22, 256  ;;  %p1985_p11 = scmp.ne.s32.totalorder %s1973_s23, 0 }
  0x98   : > { %1121 = vmatpush3.msra.mxu1 %v581_v2  ;;  %v573_v11 = vld [vmem:[#allocation9 + $0x30] sm:$0xff]  ;;  %v572_v13 = vld [vmem:[#allocation9 + $0x28] sm:$0xff]  ;;  %v571_v14 = vld [vmem:[#allocation9 + $0x20] sm:$0xff]  ;;  %v585_v46 = vsub.s32 3, %v1857_v45  ;;  %v444_v63 = vsub.s32 0, %v1857_v45  ;;  %p1473_p0 = scmp.ne.s32.totalorder %s1906_s22, %s1472_s15  ;;  %s1562_s6 = smov [#allocation14]  }
  0x99   : > { %405 = vadd.xlane.f32.xlu0 %v1840_v3  ;;  %1122 = vmatprep.subr.mxu1 %v580_v4  ;;  %v565_v12 = vld [vmem:[%s344_s14] sm:$0xff]  ;;  %v441_v15 = vld [vmem:[#allocation8 + $0x78] sm:$0xff]  ;;  %v439_v18 = vld [vmem:[#allocation8 + $0x68] sm:$0xff]  ;;  %s1476_s17 = sshll.u32 %s1562_s6, 4  ;;  %s1477_s17 = int_to_ptr.vmem [resolvable:$false] %s1476_s17 }
  0x9a   : > { %1123 = vmatpush3.msra.mxu1 %v580_v4  ;;  %1150 = vmatprep.mubr.f32.mxu1 %v565_v12  ;;  %v440_v16 = vld [vmem:[#allocation8 + $0x70] sm:$0xff]  ;;  %v570_v17 = vld [vmem:[#allocation9 + $0x18] sm:$0xff]  ;;  %v438_v20 = vld [vmem:[#allocation8 + $0x60] sm:$0xff]  ;;  %p1474_p5 = pnand %p1473_p0, %p1985_p11  ;;  %s1478_s13 = scalar_lea.vmem %s1477_s17, 512 }
  0x9b   : > { %1124 = vmatprep.subr.mxu1 %v579_v5  ;;  %1083 = vmatprep.subr.mxu0 %v441_v15  ;;  %v569_v19 = vld [vmem:[#allocation9 + $0x10] sm:$0xff]  ;;  %v568_v21 = vld [vmem:[#allocation9 + $0x8] sm:$0xff]  ;;  %v567_v22 = vld [vmem:[#allocation9] sm:$0xff]  ;;  %p1479_p4 = scmp.lt.s32.totalorder %s1906_s22, %s1477_s17  ;;  %p1480_p6 = scmp.lt.s32.totalorder %s1478_s13, %s1472_s15 }
  0x9c   : > { %1125 = vmatpush3.msra.mxu1 %v579_v5  ;;  %1084 = vmatpush3.msra.mxu0 %v441_v15  ;;  %v566_v23 = vld [vmem:[%s344_s14 + $0x8] sm:$0xff]  ;;  %v436_v33 = vld [vmem:[#allocation8 + $0x50] sm:$0xff]  ;;  %v434_v35 = vld [vmem:[#allocation8 + $0x40] sm:$0xff]  ;;  %p1475_p12 = pneg %p1474_p5 }
  0x9d   : > { %1126 = vmatprep.subr.mxu1 %v578_v6  ;;  %1085 = vmatprep.subr.mxu0 %v440_v16  ;;  %v437_v32 = vld [vmem:[#allocation8 + $0x58] sm:$0xff]  ;;  %v435_v34 = vld [vmem:[#allocation8 + $0x48] sm:$0xff]  ;;  %v432_v37 = vld [vmem:[#allocation8 + $0x30] sm:$0xff]  ;;  %p1481_p10 = por %p1480_p6, %p1479_p4 }
  0x9e   : > { %1127 = vmatpush3.msra.mxu1 %v578_v6  ;;  %1086 = vmatpush3.msra.mxu0 %v440_v16  ;;  %v433_v36 = vld [vmem:[#allocation8 + $0x38] sm:$0xff]  ;;  %v431_v38 = vld [vmem:[#allocation8 + $0x28] sm:$0xff]  ;;  %v430_v39 = vld [vmem:[#allocation8 + $0x20] sm:$0xff] }
  0x9f   : > { %1128 = vmatprep.subr.mxu1 %v577_v7  ;;  %1087 = vmatprep.subr.mxu0 %v439_v18  ;;  %v429_v40 = vld [vmem:[#allocation8 + $0x18] sm:$0xff]  ;;  %v428_v41 = vld [vmem:[#allocation8 + $0x10] sm:$0xff]  ;;  %v427_v42 = vld [vmem:[#allocation8 + $0x8] sm:$0xff]  ;;  %p1482_p3 = pnand %p1481_p10, %p1475_p12 }
  0xa0   : > { %1129 = vmatpush3.msra.mxu1 %v577_v7  ;;  %1088 = vmatpush3.msra.mxu0 %v439_v18  ;;  %v426_v43 = vld [vmem:[#allocation8] sm:$0xff]  ;;  %v718_v44 = vld [vmem:[#allocation11 + $0x10] sm:$0xff] }
  0xa1   : > { %1130 = vmatprep.subr.mxu1 %v576_v8  ;;  %1089 = vmatprep.subr.mxu0 %v438_v20  ;;  %v1860_v47 = vld [vmem:[#allocation12] sm:$0xff] }
  0xa2   : > { %1131 = vmatpush3.msra.mxu1 %v576_v8  ;;  %1090 = vmatpush3.msra.mxu0 %v438_v20  ;;  %v586_v48 = vrot.slane %v1860_v47, %v585_v46  ;;  %v717_v46 = vld [vmem:[#allocation11 + $0x8] sm:$0xff] }
  0xa3   : > { %1132 = vmatprep.subr.mxu1 %v575_v9  ;;  %1091 = vmatprep.subr.mxu0 %v437_v32 }
  0xa4   : > { %1133 = vmatpush3.msra.mxu1 %v575_v9  ;;  %1092 = vmatpush3.msra.mxu0 %v437_v32 }
  0xa5   : > { %1134 = vmatprep.subr.mxu1 %v574_v10  ;;  %1093 = vmatprep.subr.mxu0 %v436_v33 }
  0xa6   : > { %1135 = vmatpush3.msra.mxu1 %v574_v10  ;;  %1094 = vmatpush3.msra.mxu0 %v436_v33  ;;  %v729_v33 = vld [vmem:[#allocation11 + $0x68] sm:$0xff] }
  0xa7   : > { %1136 = vmatprep.subr.mxu1 %v573_v11  ;;  %1095 = vmatprep.subr.mxu0 %v435_v34 }
  0xa8   : > { %1137 = vmatpush3.msra.mxu1 %v573_v11  ;;  %1096 = vmatpush3.msra.mxu0 %v435_v34  ;;  %v728_v34 = vld [vmem:[#allocation11 + $0x60] sm:$0xff] }
  0xa9   : > { %1138 = vmatprep.subr.mxu1 %v572_v13  ;;  %1097 = vmatprep.subr.mxu0 %v434_v35 }
  0xaa   : > { %1139 = vmatpush3.msra.mxu1 %v572_v13  ;;  %1098 = vmatpush3.msra.mxu0 %v434_v35  ;;  %v727_v35 = vld [vmem:[#allocation11 + $0x58] sm:$0xff] }
  0xab   : > { %1140 = vmatprep.subr.mxu1 %v571_v14  ;;  %1099 = vmatprep.subr.mxu0 %v433_v36 }
  0xac   : > { %1141 = vmatpush3.msra.mxu1 %v571_v14  ;;  %1100 = vmatpush3.msra.mxu0 %v433_v36  ;;  %v726_v36 = vld [vmem:[#allocation11 + $0x50] sm:$0xff] }
  0xad   : > { %1142 = vmatprep.subr.mxu1 %v570_v17  ;;  %1101 = vmatprep.subr.mxu0 %v432_v37 }
  0xae   : > { %1143 = vmatpush3.msra.mxu1 %v570_v17  ;;  %1102 = vmatpush3.msra.mxu0 %v432_v37  ;;  %v725_v37 = vld [vmem:[#allocation11 + $0x48] sm:$0xff] }
  0xaf   : > { %1144 = vmatprep.subr.mxu1 %v569_v19  ;;  %1103 = vmatprep.subr.mxu0 %v431_v38 }
  0xb0   : > { %1145 = vmatpush3.msra.mxu1 %v569_v19  ;;  %1104 = vmatpush3.msra.mxu0 %v431_v38  ;;  %v724_v38 = vld [vmem:[#allocation11 + $0x40] sm:$0xff] }
  0xb1   : > { %1146 = vmatprep.subr.mxu1 %v568_v21  ;;  %1105 = vmatprep.subr.mxu0 %v430_v39 }
  0xb2   : > { %1147 = vmatpush3.msra.mxu1 %v568_v21  ;;  %1106 = vmatpush3.msra.mxu0 %v430_v39  ;;  %v723_v39 = vld [vmem:[#allocation11 + $0x38] sm:$0xff] }
  0xb3   : > { %1148 = vmatprep.subr.mxu1 %v567_v22  ;;  %1107 = vmatprep.subr.mxu0 %v429_v40 }
  0xb4   : > { %1149 = vmatpush3.msra.mxu1 %v567_v22  ;;  %1108 = vmatpush3.msra.mxu0 %v429_v40  ;;  %v722_v40 = vld [vmem:[#allocation11 + $0x30] sm:$0xff] }
  0xb5   : > { %1151 = vmatmul.mubr.f32.vlgmr.msra.gmra.mxu1 %v566_v23  ;;  %1109 = vmatprep.subr.mxu0 %v428_v41  ;;  %v731_v23 = vld [vmem:[#allocation11 + $0x78] sm:$0xff] }
  0xb6   : > { %1110 = vmatpush3.msra.mxu0 %v428_v41  ;;  %v721_v41 = vld [vmem:[#allocation11 + $0x28] sm:$0xff] }
  0xb7   : > { %1111 = vmatprep.subr.mxu0 %v427_v42 }
  0xb8   : > { %1112 = vmatpush3.msra.mxu0 %v427_v42  ;;  %v720_v42 = vld [vmem:[#allocation11 + $0x20] sm:$0xff] }
  0xb9   : > { %1113 = vmatprep.subr.mxu0 %v426_v43 }
  0xba   : > { %1114 = vmatpush3.msra.mxu0 %v426_v43  ;;  %v719_v43 = vld [vmem:[#allocation11 + $0x18] sm:$0xff] }
  0xbb   : > { %1153 = vmatprep.subr.mxu0 %v731_v23 }
 0x11e   : > { %v404_v24 = vpop.xlane.xlu0 %403 }
 0x11f   : > { %v408_v25 = vmul.f32 0.0078125, %v404_v24  ;;  %v730_v24 = vld [vmem:[#allocation11 + $0x70] sm:$0xff] }
 0x121   : > { %v1848_v26 = vsub.f32 %v1837_v0, %v408_v25  ;;  %v445_v0 = vrot.slane %v1860_v47, %v444_v63 }
 0x122   : > { %v406_v27 = vpop.xlane.xlu0 %405 }
 0x123   : > { %v409_v28 = vmul.f32 0.0078125, %v406_v27  ;;  %v412_v29 = vmul.f32 %v1848_v26, %v1848_v26 }
 0x125   : > { %v1853_v30 = vsub.f32 %v1840_v3, %v409_v28  ;;  %414 = vadd.xlane.f32.xlu1 %v412_v29 }
 0x127   : > { %v413_v31 = vmul.f32 %v1853_v30, %v1853_v30 }
 0x129   : > { %416 = vadd.xlane.f32.xlu1 %v413_v31 }
 0x175   : > { %v1152_v49 = vpop.f32.mrf.mxu1 }
 0x176   : > { %v659_v50 = vadd.f32 %v1152_v49, %v586_v48 }
 0x177   : > { %v653_v51 = vpop.f32.mrf.mxu1 }
 0x178   : > { %v654_v52 = vadd.f32 %v653_v51, %v586_v48  ;;  %664 = vadd.xlane.f32.xlu1 %v659_v50  ;;  %v716_v48 = vld [vmem:[#allocation11] sm:$0xff] }
 0x17a   : > { %662 = vadd.xlane.f32.xlu0 %v654_v52 }
 0x1ae   : > { %v415_v53 = vpop.xlane.xlu1 %414 }
 0x1af   : > { %v418_v54 = vmul.f32 0.0078125, %v415_v53 }
 0x1b1   : > { %v420_v55 = vadd.f32 1e-05, %v418_v54 }
 0x1b2   : > { %v417_v56 = vpop.xlane.xlu1 %416 }
 0x1b3   : > { %1284 = vrsqrt.f32 %v420_v55  ;;  %v419_v57 = vmul.f32 0.0078125, %v417_v56  ;;  %v686_v56 = vsub.s32 4, %v1857_v45 }
 0x1b5   : > { %v421_v58 = vadd.f32 1e-05, %v419_v57 }
 0x1b7   : > { %1286 = vrsqrt.f32 %v421_v58 }
 0x1c0   : > { %v1285_v59 = vpop.eup %1284 }
 0x1c1   : > { %v424_v60 = vmul.f32 %v1285_v59, %v1848_v26  ;;  %v687_v59 = vrot.slane %v1860_v47, %v686_v56 }
 0x1c3   : > { %1115 = vmatprep.mubr.f32.mxu0 %v424_v60  ;;  %v692_v60 = vsub.s32 5, %v1857_v45 }
 0x1c4   : > { %v1287_v61 = vpop.eup %1286 }
 0x1c5   : > { %v425_v62 = vmul.f32 %v1287_v61, %v1853_v30  ;;  %v693_v63 = vrot.slane %v1860_v47, %v692_v60  ;;  %v837_v60 = vsub.s32 7, %v1857_v45 }
 0x1c7   : > { %1116 = vmatmul.mubr.f32.vlgmr.msra.gmra.mxu0 %v425_v62 }
 0x1c8   : > { %1154 = vmatpush3.msra.mxu0 %v731_v23 }
 0x1c9   : > { %1155 = vmatprep.subr.mxu0 %v730_v24 }
 0x1ca   : > { %1156 = vmatpush3.msra.mxu0 %v730_v24 }
 0x1cb   : > { %1157 = vmatprep.subr.mxu0 %v729_v33 }
 0x1cc   : > { %1158 = vmatpush3.msra.mxu0 %v729_v33 }
 0x1cd   : > { %1159 = vmatprep.subr.mxu0 %v728_v34 }
 0x1ce   : > { %1160 = vmatpush3.msra.mxu0 %v728_v34 }
 0x1cf   : > { %1161 = vmatprep.subr.mxu0 %v727_v35 }
 0x1d0   : > { %1162 = vmatpush3.msra.mxu0 %v727_v35 }
 0x1d1   : > { %1163 = vmatprep.subr.mxu0 %v726_v36 }
 0x1d2   : > { %1164 = vmatpush3.msra.mxu0 %v726_v36 }
 0x1d3   : > { %1165 = vmatprep.subr.mxu0 %v725_v37 }
 0x1d4   : > { %1166 = vmatpush3.msra.mxu0 %v725_v37 }
 0x1d5   : > { %1167 = vmatprep.subr.mxu0 %v724_v38 }
 0x1d6   : > { %1168 = vmatpush3.msra.mxu0 %v724_v38  ;;  %v734_v38 = vsub.s32 6, %v1857_v45 }
 0x1d7   : > { %1169 = vmatprep.subr.mxu0 %v723_v39 }
 0x1d8   : > { %1170 = vmatpush3.msra.mxu0 %v723_v39 }
 0x1d9   : > { %1171 = vmatprep.subr.mxu0 %v722_v40 }
 0x1da   : > { %1172 = vmatpush3.msra.mxu0 %v722_v40 }
 0x1db   : > { %1173 = vmatprep.subr.mxu0 %v721_v41 }
 0x1dc   : > { %1174 = vmatpush3.msra.mxu0 %v721_v41 }
 0x1dd   : > { %1175 = vmatprep.subr.mxu0 %v720_v42 }
 0x1de   : > { %1176 = vmatpush3.msra.mxu0 %v720_v42 }
 0x1df   : > { %1177 = vmatprep.subr.mxu0 %v719_v43 }
 0x1e0   : > { %1178 = vmatpush3.msra.mxu0 %v719_v43 }
 0x1e1   : > { %1179 = vmatprep.subr.mxu0 %v718_v44 }
 0x1e2   : > { %1180 = vmatpush3.msra.mxu0 %v718_v44 }
 0x1e3   : > { %1181 = vmatprep.subr.mxu0 %v717_v46 }
 0x1e4   : > { %1182 = vmatpush3.msra.mxu0 %v717_v46 }
 0x1e5   : > { %1183 = vmatprep.subr.mxu0 %v716_v48 }
 0x1e6   : > { %1184 = vmatpush3.msra.mxu0 %v716_v48 }
 0x201   : > { %v665_v7 = vpop.xlane.xlu1 %664 }
 0x202   : > { %v667_v9 = vmul.f32 0.0078125, %v665_v7 }
 0x203   : > { %v663_v8 = vpop.xlane.xlu0 %662 }
 0x204   : > { %v666_v11 = vmul.f32 0.0078125, %v663_v8  ;;  %v1867_v15 = vsub.f32 %v659_v50, %v667_v9 }
 0x206   : > { %v1869_v19 = vsub.f32 %v654_v52, %v666_v11  ;;  %v671_v21 = vmul.f32 %v1867_v15, %v1867_v15 }
 0x208   : > { %v670_v22 = vmul.f32 %v1869_v19, %v1869_v19 }
 0x287   : > { %v1117_v1 = vpop.f32.mrf.mxu0 }
 0x288   : > { %v518_v2 = vadd.f32 %v1117_v1, %v445_v0 }
 0x289   : > { %v512_v3 = vpop.f32.mrf.mxu0 }
 0x28a   : > { %v524_v4 = vmul.f32 0.70710677, %v518_v2  ;;  %v513_v5 = vadd.f32 %v512_v3, %v445_v0  ;;  %v522_v12 = vmul.f32 0.5, %v518_v2 }
 0x28c   : > { %1288 = verf.f32 %v524_v4  ;;  %v523_v6 = vmul.f32 0.70710677, %v513_v5  ;;  %v521_v16 = vmul.f32 0.5, %v513_v5 }
 0x28e   : > { %1290 = verf.f32 %v523_v6 }
 0x299   : > { %v1289_v10 = vpop.eup %1288 }
 0x29a   : > { %v528_v13 = vadd.f32 1.0, %v1289_v10 }
 0x29b   : > { %v1291_v14 = vpop.eup %1290 }
 0x29c   : > { %v530_v17 = vmul.f32 %v528_v13, %v522_v12  ;;  %v527_v18 = vadd.f32 1.0, %v1291_v14 }
 0x29e   : > { %533 = vadd.xlane.f32.xlu1 %v530_v17  ;;  %v529_v20 = vmul.f32 %v527_v18, %v521_v16  ;;  %v561_v16 = vsub.s32 2, %v1857_v45 }
 0x2a0   : > { %531 = vadd.xlane.f32.xlu0 %v529_v20  ;;  %v562_v24 = vrot.slane %v1860_v47, %v561_v16 }
 0x2a2   : > { %674 = vadd.xlane.f32.xlu1 %v671_v21  ;;  %v709_v21 = vstv %s696_s8 }
 0x2a4   : > { %672 = vadd.xlane.f32.xlu0 %v670_v22 }
 0x327   : > { %v534_v25 = vpop.xlane.xlu1 %533 }
 0x328   : > { %v536_v26 = vmul.f32 0.0078125, %v534_v25 }
 0x329   : > { %v532_v27 = vpop.xlane.xlu0 %531 }
 0x32a   : > { %v1875_v28 = vsub.f32 %v530_v17, %v536_v26  ;;  %v535_v29 = vmul.f32 0.0078125, %v532_v27 }
 0x32b   : > { %v675_v50 = vpop.xlane.xlu1 %674 }
 0x32c   : > { %v1877_v30 = vsub.f32 %v529_v20, %v535_v29  ;;  %v540_v31 = vmul.f32 %v1875_v28, %v1875_v28  ;;  %v677_v52 = vmul.f32 0.0078125, %v675_v50 }
 0x32d   : > { %v673_v49 = vpop.xlane.xlu0 %672 }
 0x32e   : > { %543 = vadd.xlane.f32.xlu1 %v540_v31  ;;  %v539_v32 = vmul.f32 %v1877_v30, %v1877_v30  ;;  %v676_v51 = vmul.f32 0.0078125, %v673_v49  ;;  %v679_v54 = vadd.f32 1e-05, %v677_v52 }
 0x330   : > { %541 = vadd.xlane.f32.xlu0 %v539_v32  ;;  %v678_v53 = vadd.f32 1e-05, %v676_v51 }
 0x332   : > { %1292 = vrsqrt.f32 %v678_v53 }
 0x333   : > { %1294 = vrsqrt.f32 %v679_v54 }
 0x33f   : > { %v1293_v55 = vpop.eup %1292 }
 0x340   : > { %v1295_v57 = vpop.eup %1294  ;;  %v682_v58 = vmul.f32 %v1293_v55, %v1869_v19 }
 0x341   : > { %v683_v61 = vmul.f32 %v1295_v57, %v1867_v15  ;;  %v555_v15 = vsub.s32 1, %v1857_v45 }
 0x342   : > { %v688_v62 = vmul.f32 %v687_v59, %v682_v58 }
 0x343   : > { %v689_v0 = vmul.f32 %v687_v59, %v683_v61  ;;  %v556_v18 = vrot.slane %v1860_v47, %v555_v15  ;;  %v838_v61 = vrot.slane %v1860_v47, %v837_v60 }
 0x344   : > { %v694_v1 = vadd.f32 %v693_v63, %v688_v62 }
 0x345   : > { %v695_v2 = vadd.f32 %v693_v63, %v689_v0 }
 0x346   : > { %v1018_v3 = vmul.f32 -1.442695, %v694_v1  ;;  %v1020_v1 = vld [vmem:[#allocation12 + $0x8] ss:$0 sm:$0xff] }
 0x347   : > { %v1019_v4 = vmul.f32 -1.442695, %v695_v2 }
 0x348   : > { %1296 = vpow2.f32 %v1018_v3 }
 0x349   : > { %1298 = vpow2.f32 %v1019_v4 }
 0x355   : > { %v1297_v5 = vpop.eup %1296 }
 0x356   : > { %v1299_v6 = vpop.eup %1298  ;;  %v703_v8 = vadd.f32 1.0, %v1297_v5 }
 0x357   : > { %v704_v11 = vadd.f32 1.0, %v1299_v6 }
 0x358   : > { %1300 = vrcp.f32 %v703_v8 }
 0x365   : > { %v1301_v17 = vpop.eup %1300 }
 0x366   : > { %v710_v26 = vmul.f32 %v1301_v17, %v709_v21 }
 0x368   : > { %v712_v34 = vadd.f32 1.0, %v710_v26 }
 0x3b7   : > { %v544_v7 = vpop.xlane.xlu1 %543 }
 0x3b8   : > { %v546_v9 = vmul.f32 0.0078125, %v544_v7 }
 0x3b9   : > { %v542_v10 = vpop.xlane.xlu0 %541 }
 0x3ba   : > { %v548_v12 = vadd.f32 1e-05, %v546_v9  ;;  %v545_v13 = vmul.f32 0.0078125, %v542_v10 }
 0x3bc   : > { %1302 = vrsqrt.f32 %v548_v12  ;;  %v547_v14 = vadd.f32 1e-05, %v545_v13 }
 0x3bd   : > { %1304 = vrcp.f32 %v704_v11 }
 0x3be   : > { %1306 = vrsqrt.f32 %v547_v14 }
 0x3c9   : > { %v1303_v19 = vpop.eup %1302 }
 0x3ca   : > { %v1305_v20 = vpop.eup %1304  ;;  %v552_v22 = vmul.f32 %v1303_v19, %v1875_v28  ;;  %v735_v28 = vrot.slane %v1860_v47, %v734_v38 }
 0x3cb   : > { %v1307_v23 = vpop.eup %1306  ;;  %v711_v29 = vmul.f32 %v1305_v20, %v709_v21 }
 0x3cc   : > { %v551_v25 = vmul.f32 %v1307_v23, %v1877_v30  ;;  %v558_v27 = vmul.f32 %v556_v18, %v552_v22 }
 0x3cd   : > { %v713_v35 = vadd.f32 1.0, %v711_v29 }
 0x3ce   : > { %v557_v31 = vmul.f32 %v556_v18, %v551_v25  ;;  %v564_v32 = vadd.f32 %v562_v24, %v558_v27 }
 0x3d0   : > { %v563_v33 = vadd.f32 %v562_v24, %v557_v31  ;;  %v715_v37 = vmul.f32 %v713_v35, %v564_v32 }
 0x3d2   : > { %v714_v36 = vmul.f32 %v712_v34, %v563_v33 }
 0x3d4   : > { %1185 = vmatprep.mubr.f32.mxu0 %v714_v36 }
 0x3d5   : > { %1186 = vmatmul.mubr.f32.vlgmr.msra.gmra.mxu0 %v715_v37 }
 0x495   : > { %v1187_v39 = vpop.f32.mrf.mxu0 }
 0x496   : > { %v808_v40 = vadd.f32 %v1187_v39, %v735_v28 }
 0x497   : > { %v802_v41 = vpop.f32.mrf.mxu0 }
 0x498   : > { %v803_v30 = vadd.f32 %v802_v41, %v735_v28  ;;  %v812_v42 = vadd.f32 %v808_v40, %v564_v32 }
 0x49a   : > { %815 = vadd.xlane.f32.xlu1 %v812_v42  ;;  %v811_v43 = vadd.f32 %v803_v30, %v563_v33 }
 0x49c   : > { %813 = vadd.xlane.f32.xlu0 %v811_v43 }
 0x523   : > { %v816_v44 = vpop.xlane.xlu1 %815 }
 0x524   : > { %v818_v46 = vmul.f32 0.0078125, %v816_v44 }
 0x525   : > { %v814_v48 = vpop.xlane.xlu0 %813 }
 0x526   : > { %v820_v49 = vsub.f32 %v812_v42, %v818_v46  ;;  %v817_v50 = vmul.f32 0.0078125, %v814_v48 }
 0x528   : > { %v819_v51 = vsub.f32 %v811_v43, %v817_v50  ;;  %v822_v52 = vmul.f32 %v820_v49, %v820_v49 }
 0x52a   : > { %825 = vadd.xlane.f32.xlu1 %v822_v52  ;;  %v821_v53 = vmul.f32 %v819_v51, %v819_v51 }
 0x52c   : > { %823 = vadd.xlane.f32.xlu0 %v821_v53 }
 0x5b3   : > { %v826_v54 = vpop.xlane.xlu1 %825 }
 0x5b4   : > { %v828_v55 = vmul.f32 0.0078125, %v826_v54 }
 0x5b5   : > { %v824_v56 = vpop.xlane.xlu0 %823 }
 0x5b6   : > { %v830_v57 = vadd.f32 1e-05, %v828_v55  ;;  %v827_v58 = vmul.f32 0.0078125, %v824_v56 }
 0x5b8   : > { %1308 = vrsqrt.f32 %v830_v57  ;;  %v829_v59 = vadd.f32 1e-05, %v827_v58 }
 0x5ba   : > { %1310 = vrsqrt.f32 %v829_v59 }
 0x5c5   : > { %v1309_v62 = vpop.eup %1308 }
 0x5c6   : > { %v834_v63 = vmul.f32 %v1309_v62, %v820_v49 }
 0x5c7   : > { %v1311_v0 = vpop.eup %1310 }
 0x5c8   : > { %v840_v2 = vmul.f32 %v838_v61, %v834_v63  ;;  %v833_v3 = vmul.f32 %v1311_v0, %v819_v51 }
 0x5ca   : > { %v846_v4 = vadd.f32 %v1020_v1, %v840_v2  ;;  %v839_v5 = vmul.f32 %v838_v61, %v833_v3 }
 0x5cc   : > { %v845_v45 = vadd.f32 %v1020_v1, %v839_v5  ;;  %848 = vst [vmem:[%s395_s16 + $0x8] sm:$0xff] %v846_v4 }
 0x5ce   : > { %847 = vst [vmem:[%s395_s16] sm:$0xff] %v845_v45 }
 0x5cf   : > { %1485 = shalt.err (!%p1482_p3)
}
 0x5d0   : > { %s1486_s11 = scalar_lea.hbm %s1904_s12, 256  ;;  %s1490_s10 = scalar_lea.hbm %s1956_s7, 512 }
 0x5d1   : > { %p1487_p8 = scmp.ne.s32.totalorder %s1904_s12, %s1486_s11  ;;  %p1491_p7 = scmp.lt.s32.totalorder %s1904_s12, %s1956_s7 }
 0x5d2   : > { %p1492_p1 = scmp.lt.s32.totalorder %s1490_s10, %s1486_s11 }
 0x5d3   : > { %p1488_p2 = pnand %p1487_p8, %p1985_p11 }
 0x5d4   : > { %p1493_p13 = por %p1492_p1, %p1491_p7 }
 0x5d5   : > { %p1489_p9 = pneg %p1488_p2 }
 0x5d7   : > { %p1494_p0 = pnand %p1493_p13, %p1489_p9 }
 0x5d9   : > { %1497 = shalt.err (!%p1494_p0)
}
 0x5da   : > { %s1563_s8 = smov 128   ;;  %s1564_s2 = smov 8  }
 0x5db   : > { %1208 = dma.vmem_to_hbm [thread:$0]  (%p1985_p11), %s1906_s22, 256, %s1904_s12, %s850_s20, %s1563_s8, %s1563_s8, %s1564_s2  }
 0x5dc PF: > { %s878_s16 = sand.u32 1, %s1540_s26   ;;  %p1986_p5 = scmp.ne.s32.totalorder %s1968_s9, 0 }
 0x5dd   : > { %p1987_p12 = scmp.ge.s32.totalorder %s1552_s29, 2  ;;  %s879_s3 = scalar_lea.sflag [#allocation5], %s878_s16 }
 0x5df   : > { %p1231_p4 = pnand %p1987_p12, %p1986_p5 }
 0x5e1   : > { %p1232_p6 = pneg %p1231_p4 }
 0x5e3   : > { %1535 = dma.done.wait (%p1232_p6), %s879_s3, 256  }
 0x5e4   : > { %1537 = vsyncadd (%p1232_p6), %s879_s3, 4294967040  ;;  %p26_p10 = scmp.ge.s32.totalorder %s1708_s21, 4   ;;  %s1988_s26 = smov %s1544_s27 }
 0x5e5   : > { %s1989_s27 = smov %s1548_s28  ;;  %s1990_s28 = smov %s1724_s24 }
 0x5e6   : > { %s1991_s29 = smov %s1708_s21  ;;  %28 = sbr.rel (!%p26_p10) target bundleno = 14 (0xe), region = 122 }
 0x5eb   :  { %884 = vsyncpa [#allocation4], 1 }
 0x5ec   :  { %886 = vsyncpa [#allocation4 + $0x1], 1 }
 0x5ed   :  { %887 = vsyncpa [#allocation7], 1 }
 0x5ee   :  { %889 = vsyncpa [#allocation7 + $0x1], 1 }
 0x5ef   :  { %890 = vsyncpa [#allocation10], 1 }
 0x5f0   :  { %891 = vsyncpa [#allocation13], 1 }
 0x5f1   :  { %892 = vsyncpa [#allocation5], 1 }
 0x5f2   :  { %894 = vsyncpa [#allocation5 + $0x1], 1 }

</bundles_post_ra>
